<compile_context>
chip_gen: v5e
topology: v5e:2x2
jax: 0.10.0
libtpu: 0.0.40
codegen_flags: <defaults>
</compile_context>

<pallas_src>
import math

import jax
import jax.numpy as jnp
from jax.experimental import pallas as pl
from jax.experimental.pallas import tpu as pltpu

_HALF_LOG_2PI = 0.5 * math.log(2.0 * math.pi)


def _round_up(x, m):
    return ((x + m - 1) // m) * m


def _tile_rows(batch, block_rows):
    """Pick (tile_rows, padded_batch).

    Small batches: a single full-extent tile (lane dim == full array dim, so
    no 128-alignment needed on the feature-major output).  Large batches:
    lane-aligned tiles (multiple of 128) capped at `block_rows`, split into
    >= 2 tiles so both v7x TensorCores work under dimension_semantics
    ("parallel",).
    """
    if batch < 256:
        tb = _round_up(max(batch, 1), 8)
        return tb, tb
    tb = min(_round_up(block_rows, 128), _round_up(pl.cdiv(batch, 2), 128))
    return tb, _round_up(batch, tb)


# ----------------------------- Pallas kernels ------------------------------

def actor_fused_kernel(x_ref, eps_ref, w1_ref, b1_ref, w2_ref, b2_ref,
                       w3_ref, b3_ref, logstd_ref, out_ref):
    """Fused MLP forward + Normal sampling + log_prob of the sampled actions.

    Feature-major output block [F_pad, tb]:
      rows [0:A)          mu^T
      rows [A:2A)         actions^T
      row  2A             sum_{-1} log_prob(actions)
      rows [2A+1:F_pad)   zero padding
    """
    act_dim = w3_ref.shape[1]
    tb = x_ref.shape[0]
    f_pad = out_ref.shape[0]

    x = x_ref[...]
    # bf16 operands into the MXU, f32 accumulation; elementwise math in f32.
    h1 = jnp.tanh(
        jnp.dot(x.astype(jnp.bfloat16), w1_ref[...],
                preferred_element_type=jnp.float32) + b1_ref[...])
    h2 = jnp.tanh(
        jnp.dot(h1.astype(jnp.bfloat16), w2_ref[...],
                preferred_element_type=jnp.float32) + b2_ref[...])
    mu = jnp.dot(h2.astype(jnp.bfloat16), w3_ref[...],
                 preferred_element_type=jnp.float32) + b3_ref[...]

    log_std = logstd_ref[...]                        # [1, A] f32
    std = jnp.exp(log_std)                           # one EUP exp per tile
    eps = eps_ref[...]
    actions = mu + std * eps                         # reparameterized sample

    # log_prob of the actions sampled above: (actions - mu)/std == eps exactly,
    # so no divide and no second exp are needed.
    lp = jnp.sum(-0.5 * jnp.square(eps) - log_std - _HALF_LOG_2PI,
                 axis=-1, keepdims=True)             # [tb, 1]

    pieces = [mu, actions, lp]
    pad = f_pad - (2 * act_dim + 1)
    if pad:
        pieces.append(jnp.zeros((tb, pad), jnp.float32))
    slab = jnp.concatenate(pieces, axis=-1)          # [tb, F_pad], in registers
    out_ref[...] = slab.T                            # single full-width store


def log_prob_kernel(mu_ref, logstd_ref, act_ref, out_ref):
    """General Normal(mu, exp(log_std)).log_prob(actions).sum(-1) (old actions)."""
    log_std = logstd_ref[...]
    inv_std = jnp.exp(-log_std)                      # multiply, never divide
    z = (act_ref[...] - mu_ref[...]) * inv_std
    lp = jnp.sum(-0.5 * jnp.square(z) - log_std - _HALF_LOG_2PI,
                 axis=-1, keepdims=True)             # [tb, 1]
    out_ref[...] = lp.T                              # [1, tb], lane-dense store


# ------------------------------ JAX wrappers --------------------------------

_COMPILER_PARAMS = pltpu.CompilerParams(
    dimension_semantics=("parallel",),               # shard batch tiles (v7x)
)


def init_params(key, obs_dim, hidden, act_dim):
    """Synthetic parameters (shapes match the PyTorch module). Weights in bf16."""
    k1, k2, k3 = jax.random.split(key, 3)
    scale = 0.1
    return {
        "w1": (scale * jax.random.normal(k1, (obs_dim, hidden), jnp.float32)
               ).astype(jnp.bfloat16),
        "b1": jnp.zeros((1, hidden), jnp.float32),
        "w2": (scale * jax.random.normal(k2, (hidden, hidden), jnp.float32)
               ).astype(jnp.bfloat16),
        "b2": jnp.zeros((1, hidden), jnp.float32),
        "w3": (scale * jax.random.normal(k3, (hidden, act_dim), jnp.float32)
               ).astype(jnp.bfloat16),
        "b3": jnp.zeros((1, act_dim), jnp.float32),
        # log_std = -0.5 * ones(act_dim), kept 2-D [1, act_dim] for TPU layout.
        "log_std": -0.5 * jnp.ones((1, act_dim), jnp.float32),
    }


def actor_forward(params, states, eps, *, block_rows=1024):
    """Equivalent of ActorContinous.forward (+ log_prob of the sampled actions).

    Returns ((mu, std), actions, log_prob). `(mu, std)` plays the role of `pi`.
    `eps` is the externally supplied standard-normal noise used for pi.sample().
    """
    batch, obs_dim = states.shape
    act_dim = params["w3"].shape[1]
    f_pad = _round_up(2 * act_dim + 1, 8)

    tb, pad_b = _tile_rows(batch, block_rows)
    if pad_b != batch:
        states = jnp.pad(states, ((0, pad_b - batch), (0, 0)))
        eps = jnp.pad(eps, ((0, pad_b - batch), (0, 0)))

    packed = pl.pallas_call(
        actor_fused_kernel,
        out_shape=jax.ShapeDtypeStruct((f_pad, pad_b), jnp.float32),
        grid_spec=pltpu.PrefetchScalarGridSpec(
            num_scalar_prefetch=0,
            grid=(pad_b // tb,),
            in_specs=[
                pl.BlockSpec((tb, obs_dim), lambda i: (i, 0)),        # states
                pl.BlockSpec((tb, act_dim), lambda i: (i, 0)),        # eps
                pl.BlockSpec(params["w1"].shape, lambda i: (0, 0)),   # weights
                pl.BlockSpec(params["b1"].shape, lambda i: (0, 0)),   #   stay
                pl.BlockSpec(params["w2"].shape, lambda i: (0, 0)),   #   VMEM-
                pl.BlockSpec(params["b2"].shape, lambda i: (0, 0)),   #   resident
                pl.BlockSpec(params["w3"].shape, lambda i: (0, 0)),
                pl.BlockSpec(params["b3"].shape, lambda i: (0, 0)),
                pl.BlockSpec(params["log_std"].shape, lambda i: (0, 0)),
            ],
            out_specs=pl.BlockSpec((f_pad, tb), lambda i: (0, i)),
        ),
        compiler_params=_COMPILER_PARAMS,
    )(states, eps,
      params["w1"], params["b1"],
      params["w2"], params["b2"],
      params["w3"], params["b3"],
      params["log_std"])

    mu = packed[0:act_dim, :batch].T
    actions = packed[act_dim:2 * act_dim, :batch].T
    log_prob = packed[2 * act_dim, :batch]
    std = jnp.exp(params["log_std"])[0]              # 4-element op, in wrapper
    return (mu, std), actions, log_prob


def get_log_prob(params, mu, actions, *, block_rows=1024):
    """Equivalent of ActorContinous.get_log_prob(pi, actions) for any actions."""
    batch, act_dim = mu.shape
    tb, pad_b = _tile_rows(batch, block_rows)
    if pad_b != batch:
        mu = jnp.pad(mu, ((0, pad_b - batch), (0, 0)))
        actions = jnp.pad(actions, ((0, pad_b - batch), (0, 0)))

    out = pl.pallas_call(
        log_prob_kernel,
        out_shape=jax.ShapeDtypeStruct((1, pad_b), jnp.float32),
        grid_spec=pltpu.PrefetchScalarGridSpec(
            num_scalar_prefetch=0,
            grid=(pad_b // tb,),
            in_specs=[
                pl.BlockSpec((tb, act_dim), lambda i: (i, 0)),
                pl.BlockSpec(params["log_std"].shape, lambda i: (0, 0)),
                pl.BlockSpec((tb, act_dim), lambda i: (i, 0)),
            ],
            out_specs=pl.BlockSpec((1, tb), lambda i: (0, i)),
        ),
        compiler_params=_COMPILER_PARAMS,
    )(mu, params["log_std"], actions)
    return out[0, :batch]


# ---------------------------------- main ------------------------------------

if __name__ == "__main__":
    B, OBS_DIM, HIDDEN, ACT_DIM = 8, 16, 32, 4

    root = jax.random.PRNGKey(0)
    k_params, k_states, k_eps = jax.random.split(root, 3)

    params = init_params(k_params, OBS_DIM, HIDDEN, ACT_DIM)
    states = jax.random.normal(k_states, (B, OBS_DIM), jnp.float32)
    # Standard-normal noise used to draw pi.sample() via reparameterization.
    eps = jax.random.normal(k_eps, (B, ACT_DIM), jnp.float32)

    (mu, std), actions, logp = actor_forward(params, states, eps)
    logp_standalone = get_log_prob(params, mu, actions)

    jax.block_until_ready((mu, std, actions, logp, logp_standalone))

    # Reference (plain JAX, same bf16-operand / f32-accumulate math).
    h1 = jnp.tanh(jnp.dot(states.astype(jnp.bfloat16), params["w1"],
                          preferred_element_type=jnp.float32) + params["b1"])
    h2 = jnp.tanh(jnp.dot(h1.astype(jnp.bfloat16), params["w2"],
                          preferred_element_type=jnp.float32) + params["b2"])
    mu_ref = jnp.dot(h2.astype(jnp.bfloat16), params["w3"],
                     preferred_element_type=jnp.float32) + params["b3"]
    std_ref = jnp.exp(params["log_std"])[0]
    act_ref = mu_ref + std_ref * eps
    lp_ref = jnp.sum(
        -0.5 * jnp.square((act_ref - mu_ref) / std_ref)
        - params["log_std"] - _HALF_LOG_2PI, axis=-1)

    assert mu.shape == (B, ACT_DIM) and actions.shape == (B, ACT_DIM)
    assert std.shape == (ACT_DIM,) and logp.shape == (B,)
    assert jnp.allclose(mu, mu_ref, atol=2e-3)
    assert jnp.allclose(std, std_ref, atol=1e-5)
    assert jnp.allclose(actions, act_ref, atol=2e-3)
    assert jnp.allclose(logp, lp_ref, atol=1e-3)
    assert jnp.allclose(logp_standalone, logp, atol=1e-4)

    print("KERNEL_OK")
</pallas_src>

<mosaic_0001>
module attributes {stable_mosaic.version = 11 : i64} {
  func.func @actor_fused_kernel(%arg0: i32, %arg1: memref<8x16xf32, #tpu.memory_space<vmem>>, %arg2: memref<8x4xf32, #tpu.memory_space<vmem>>, %arg3: memref<16x32xbf16, #tpu.memory_space<vmem>>, %arg4: memref<1x32xf32, #tpu.memory_space<vmem>>, %arg5: memref<32x32xbf16, #tpu.memory_space<vmem>>, %arg6: memref<1x32xf32, #tpu.memory_space<vmem>>, %arg7: memref<32x4xbf16, #tpu.memory_space<vmem>>, %arg8: memref<1x4xf32, #tpu.memory_space<vmem>>, %arg9: memref<1x4xf32, #tpu.memory_space<vmem>>, %arg10: memref<16x8xf32, #tpu.memory_space<vmem>>) attributes {dimension_semantics = [#tpu.dimension_semantics<parallel>], iteration_bounds = array<i64: 1>, scalar_prefetch = 0 : i64, scratch_operands = 0 : i64, tpu.core_type = #tpu.core_type<tc>, window_params = [{transform_indices = @transform_0, window_bounds = array<i64: 8, 16>}, {transform_indices = @transform_1, window_bounds = array<i64: 8, 4>}, {pipeline_mode = #tpu.pipeline_mode<synchronous>, transform_indices = @transform_2, window_bounds = array<i64: 16, 32>}, {pipeline_mode = #tpu.pipeline_mode<synchronous>, transform_indices = @transform_3, window_bounds = array<i64: 1, 32>}, {pipeline_mode = #tpu.pipeline_mode<synchronous>, transform_indices = @transform_4, window_bounds = array<i64: 32, 32>}, {pipeline_mode = #tpu.pipeline_mode<synchronous>, transform_indices = @transform_5, window_bounds = array<i64: 1, 32>}, {pipeline_mode = #tpu.pipeline_mode<synchronous>, transform_indices = @transform_6, window_bounds = array<i64: 32, 4>}, {pipeline_mode = #tpu.pipeline_mode<synchronous>, transform_indices = @transform_7, window_bounds = array<i64: 1, 4>}, {pipeline_mode = #tpu.pipeline_mode<synchronous>, transform_indices = @transform_8, window_bounds = array<i64: 1, 4>}, {transform_indices = @transform_9, window_bounds = array<i64: 16, 8>}]} {
    %c0 = arith.constant 0 : index
    %c0_0 = arith.constant 0 : index
    %0 = vector.load %arg1[%c0, %c0_0] : memref<8x16xf32, #tpu.memory_space<vmem>>, vector<8x16xf32>
    %1 = arith.truncf %0 : vector<8x16xf32> to vector<8x16xbf16>
    %c0_1 = arith.constant 0 : index
    %c0_2 = arith.constant 0 : index
    %2 = vector.load %arg3[%c0_1, %c0_2] : memref<16x32xbf16, #tpu.memory_space<vmem>>, vector<16x32xbf16>
    %cst = arith.constant dense<0.000000e+00> : vector<8x32xf32>
    %3 = tpu.matmul %1, %2, %cst {dimension_numbers = #tpu.dot_dimension_numbers<[1], [0], [0], [1], [0, 0, 1, 1], [], []>} : vector<8x16xbf16>, vector<16x32xbf16>, vector<8x32xf32> -> vector<8x32xf32>
    %c0_3 = arith.constant 0 : index
    %c0_4 = arith.constant 0 : index
    %4 = vector.load %arg4[%c0_3, %c0_4] : memref<1x32xf32, #tpu.memory_space<vmem>>, vector<1x32xf32>
    %5 = vector.broadcast %4 : vector<1x32xf32> to vector<8x32xf32>
    %6 = arith.addf %3, %5 : vector<8x32xf32>
    %7 = math.tanh %6 : vector<8x32xf32>
    %8 = arith.truncf %7 : vector<8x32xf32> to vector<8x32xbf16>
    %c0_5 = arith.constant 0 : index
    %c0_6 = arith.constant 0 : index
    %9 = vector.load %arg5[%c0_5, %c0_6] : memref<32x32xbf16, #tpu.memory_space<vmem>>, vector<32x32xbf16>
    %cst_7 = arith.constant dense<0.000000e+00> : vector<8x32xf32>
    %10 = tpu.matmul %8, %9, %cst_7 {dimension_numbers = #tpu.dot_dimension_numbers<[1], [0], [0], [1], [0, 0, 1, 1], [], []>} : vector<8x32xbf16>, vector<32x32xbf16>, vector<8x32xf32> -> vector<8x32xf32>
    %c0_8 = arith.constant 0 : index
    %c0_9 = arith.constant 0 : index
    %11 = vector.load %arg6[%c0_8, %c0_9] : memref<1x32xf32, #tpu.memory_space<vmem>>, vector<1x32xf32>
    %12 = vector.broadcast %11 : vector<1x32xf32> to vector<8x32xf32>
    %13 = arith.addf %10, %12 : vector<8x32xf32>
    %14 = math.tanh %13 : vector<8x32xf32>
    %15 = arith.truncf %14 : vector<8x32xf32> to vector<8x32xbf16>
    %c0_10 = arith.constant 0 : index
    %c0_11 = arith.constant 0 : index
    %16 = vector.load %arg7[%c0_10, %c0_11] : memref<32x4xbf16, #tpu.memory_space<vmem>>, vector<32x4xbf16>
    %cst_12 = arith.constant dense<0.000000e+00> : vector<8x4xf32>
    %17 = tpu.matmul %15, %16, %cst_12 {dimension_numbers = #tpu.dot_dimension_numbers<[1], [0], [0], [1], [0, 0, 1, 1], [], []>} : vector<8x32xbf16>, vector<32x4xbf16>, vector<8x4xf32> -> vector<8x4xf32>
    %c0_13 = arith.constant 0 : index
    %c0_14 = arith.constant 0 : index
    %18 = vector.load %arg8[%c0_13, %c0_14] : memref<1x4xf32, #tpu.memory_space<vmem>>, vector<1x4xf32>
    %19 = vector.broadcast %18 : vector<1x4xf32> to vector<8x4xf32>
    %20 = arith.addf %17, %19 : vector<8x4xf32>
    %c0_15 = arith.constant 0 : index
    %c0_16 = arith.constant 0 : index
    %21 = vector.load %arg9[%c0_15, %c0_16] : memref<1x4xf32, #tpu.memory_space<vmem>>, vector<1x4xf32>
    %22 = math.exp %21 : vector<1x4xf32>
    %c0_17 = arith.constant 0 : index
    %c0_18 = arith.constant 0 : index
    %23 = vector.load %arg2[%c0_17, %c0_18] : memref<8x4xf32, #tpu.memory_space<vmem>>, vector<8x4xf32>
    %24 = vector.broadcast %22 : vector<1x4xf32> to vector<8x4xf32>
    %25 = arith.mulf %24, %23 : vector<8x4xf32>
    %26 = arith.addf %20, %25 : vector<8x4xf32>
    %27 = arith.mulf %23, %23 : vector<8x4xf32>
    %cst_19 = arith.constant -5.000000e-01 : f32
    %28 = vector.broadcast %cst_19 : f32 to vector<8x4xf32>
    %29 = arith.mulf %28, %27 : vector<8x4xf32>
    %30 = vector.broadcast %21 : vector<1x4xf32> to vector<8x4xf32>
    %31 = arith.subf %29, %30 : vector<8x4xf32>
    %cst_20 = arith.constant 0.918938517 : f32
    %32 = vector.broadcast %cst_20 : f32 to vector<8x4xf32>
    %33 = arith.subf %31, %32 : vector<8x4xf32>
    %cst_21 = arith.constant dense<0.000000e+00> : vector<8xf32>
    %34 = vector.multi_reduction <add>, %33, %cst_21 [1] : vector<8x4xf32> to vector<8xf32>
    %35 = vector.shape_cast %34 : vector<8xf32> to vector<8x1xf32>
    %cst_22 = arith.constant 0.000000e+00 : f32
    %36 = vector.broadcast %cst_22 : f32 to vector<8x7xf32>
    %37 = tpu.concatenate %20, %26, %35, %36 in 1 : vector<8x4xf32>, vector<8x4xf32>, vector<8x1xf32>, vector<8x7xf32> -> vector<8x16xf32>
    %38 = tpu.transpose %37, [1, 0] : vector<8x16xf32> -> vector<16x8xf32>
    %c0_23 = arith.constant 0 : index
    %c0_24 = arith.constant 0 : index
    %39 = vector.load %arg10[%c0_23, %c0_24] : memref<16x8xf32, #tpu.memory_space<vmem>>, vector<16x8xf32>
    tpu.vector_store %arg10[%c0_23, %c0_24], %38 {strides = array<i32>} : memref<16x8xf32, #tpu.memory_space<vmem>>, vector<16x8xf32>,
    return
  }
  func.func @transform_0(%arg0: i32) -> (i32, i32) {
    %c0_i32 = arith.constant 0 : i32
    %c0_i32_0 = arith.constant 0 : i32
    return %arg0, %c0_i32 : i32, i32
  }
  func.func @transform_1(%arg0: i32) -> (i32, i32) {
    %c0_i32 = arith.constant 0 : i32
    %c0_i32_0 = arith.constant 0 : i32
    return %arg0, %c0_i32 : i32, i32
  }
  func.func @transform_2(%arg0: i32) -> (i32, i32) {
    %c0_i32 = arith.constant 0 : i32
    %c0_i32_0 = arith.constant 0 : i32
    %c0_i32_1 = arith.constant 0 : i32
    return %c0_i32, %c0_i32_0 : i32, i32
  }
  func.func @transform_3(%arg0: i32) -> (i32, i32) {
    %c0_i32 = arith.constant 0 : i32
    %c0_i32_0 = arith.constant 0 : i32
    %c0_i32_1 = arith.constant 0 : i32
    return %c0_i32, %c0_i32_0 : i32, i32
  }
  func.func @transform_4(%arg0: i32) -> (i32, i32) {
    %c0_i32 = arith.constant 0 : i32
    %c0_i32_0 = arith.constant 0 : i32
    %c0_i32_1 = arith.constant 0 : i32
    return %c0_i32, %c0_i32_0 : i32, i32
  }
  func.func @transform_5(%arg0: i32) -> (i32, i32) {
    %c0_i32 = arith.constant 0 : i32
    %c0_i32_0 = arith.constant 0 : i32
    %c0_i32_1 = arith.constant 0 : i32
    return %c0_i32, %c0_i32_0 : i32, i32
  }
  func.func @transform_6(%arg0: i32) -> (i32, i32) {
    %c0_i32 = arith.constant 0 : i32
    %c0_i32_0 = arith.constant 0 : i32
    %c0_i32_1 = arith.constant 0 : i32
    return %c0_i32, %c0_i32_0 : i32, i32
  }
  func.func @transform_7(%arg0: i32) -> (i32, i32) {
    %c0_i32 = arith.constant 0 : i32
    %c0_i32_0 = arith.constant 0 : i32
    %c0_i32_1 = arith.constant 0 : i32
    return %c0_i32, %c0_i32_0 : i32, i32
  }
  func.func @transform_8(%arg0: i32) -> (i32, i32) {
    %c0_i32 = arith.constant 0 : i32
    %c0_i32_0 = arith.constant 0 : i32
    %c0_i32_1 = arith.constant 0 : i32
    return %c0_i32, %c0_i32_0 : i32, i32
  }
  func.func @transform_9(%arg0: i32) -> (i32, i32) {
    %c0_i32 = arith.constant 0 : i32
    %c0_i32_0 = arith.constant 0 : i32
    return %c0_i32, %arg0 : i32, i32
  }
}

</mosaic_0001>

<bundles_post_ra>
// kernel: tpu_custom_call.1
= control target key start
LH: loop header
LB: loop body
LE: loop exit
PB: predicated region body
PF: predicated region fallthrough
CT: control target
= control target key end

     0   :  { %14 = vsyncpa [#allocation3], 0  ;;  %s294_s12 = smov [#allocation2]   ;;  %s295_s14 = smov 64   ;;  %s395_s0 = inlined_call_operand.vmem [shape: f32[8,16], index: 0, kind: input, shape index: {}]   ;;  %s396_s1 = inlined_call_operand.vmem [shape: f32[8,4], index: 1, kind: input, shape index: {}]   ;;  %s397_s2 = inlined_call_operand.hbm [shape: bf16[16,32], index: 2, kind: input, shape index: {}]   ;;  %s398_s3 = inlined_call_operand.vmem [shape: f32[1,32], index: 3, kind: input, shape index: {}]   ;;  %s399_s4 = inlined_call_operand.vmem [shape: bf16[32,32], index: 4, kind: input, shape index: {}]   ;;  %s400_s5 = inlined_call_operand.vmem [shape: f32[1,32], index: 5, kind: input, shape index: {}]   ;;  %s401_s6 = inlined_call_operand.vmem [shape: bf16[32,4], index: 6, kind: input, shape index: {}]   ;;  %s402_s7 = inlined_call_operand.vmem [shape: f32[1,4], index: 7, kind: input, shape index: {}]   ;;  %s403_s8 = inlined_call_operand.vmem [shape: f32[1,4], index: 8, kind: input, shape index: {}]   ;;  %s404_s9 = inlined_call_operand.vmem [shape: f32[16,8], index: 9, kind: output, shape index: {}]  }
   0x1   :  { %s23_s11 = sshll.u32 %s397_s2, 4  ;;  %s25_s13 = sshll.u32 %s294_s12, 4  ;;  %s24_s11 = int_to_ptr.hbm [resolvable:$true] %s23_s11  ;;  %s26_s13 = int_to_ptr.vmem [resolvable:$true] %s25_s13 }
   0x2   :  { %s296_s15 = smov 4  }
   0x3   :  { %31 = dma.hbm_to_vmem [thread:$0]  %s24_s11, 128, %s26_s13, [#allocation3], %s295_s14, %s295_s14, %s296_s15  }
   0x4   :  { %292 = dma.done.wait [#allocation3], 128  }
   0x5   :  { %293 = vsyncadd [#allocation3], 4294967168  ;;  %v249_v0 = vld [vmem:[#allocation2] sm:$0xff]  ;;  %vm63_vm0 = vcmask 130048   ;;  %v251_v3 = vld [vmem:[%s399_s4 + $0x8] sm:$0xff]  ;;  %vm102_vm1 = vcmask 261120  }
   0x6   :  { %v49_v1 = vld [vmem:[%s395_s0] sm:$0xff]  ;;  %74 = vmatpush.bf16.msra.mxu0 %v249_v0  ;;  %112 = vmatpush.bf16.msra.mxu1 %v251_v3  ;;  %v253_v11 = vld [vmem:[%s401_s6 + $0x8] sm:$0xff]  ;;  %vm173_vm2 = vcmask 31744   ;;  %vm182_vm3 = vcmask 64512   ;;  %vm184_vm4 = vcmask 72704  }
   0x7   :  { %v50_v2 = vpack.c.bf16 %v49_v1, %v49_v1  ;;  %v250_v4 = vld [vmem:[%s399_s4] sm:$0xff]  ;;  %150 = vmatpush.bf16.msra.mxu2 %v253_v11 }
   0x8   :  { %v258_v5 = vld [vmem:[%s398_s3] ss:$0 sm:$0xff] }
   0x9   :  { %229 = vmatmul.msk.bf16.vlgmr.msra.gmra.mxu0 %vm63_vm0, %v50_v2  ;;  %v252_v12 = vld [vmem:[%s401_s6] sm:$0xff] }
   0xa   :  { %113 = vmatpush.bf16.msra.mxu1 %v250_v4  ;;  %v160_v13 = vld [vmem:[%s396_s1] sm:$0xff] }
   0xb   :  { %151 = vmatpush.bf16.msra.mxu2 %v252_v12  ;;  %v166_v14 = vmul.f32 %v160_v13, %v160_v13  ;;  %v260_v15 = vld [vmem:[%s403_s8] ss:$0 sm:$0xff] }
   0xc   :  { %v259_v20 = vld [vmem:[%s400_s5] ss:$0 sm:$0xff] }
   0xd   :  { %v167_v16 = vmul.f32 -0.5, %v166_v14  ;;  %v157_v26 = vld [vmem:[%s403_s8] sm:$0x1] }
   0xe   :  { %v158_v27 = vmul.f32 1.442695, %v157_v26  ;;  %v261_v30 = vld [vmem:[%s402_s7] ss:$0 sm:$0xff] }
   0xf   :  { %v171_v17 = vsub.f32 %v167_v16, %v260_v15 }
  0x11   :  { %v248_v18 = vadd.f32 -0.9189385, %v171_v17 }
  0x13   :  { %v174_v19 = vsel %vm173_vm2, %v248_v18, 0.0 }
  0x14   :  { %175 = vadd.xlane.f32.xlu0 %v174_v19 }
  0x86   :  { %v76_v6 = vpop.f32.mrf.mxu0 }
  0x87   :  { %v77_v7 = vadd.f32 %v258_v5, %v76_v6  ;;  %v176_v36 = vpop.xlane.xlu0 %175 }
  0x89   :  { %262 = vtanh.f32 %v77_v7 }
  0x8e   :  { %v78_v8 = vpop.f32.mrf.mxu0 }
  0x8f   :  { %v263_v9 = vpop.eup %262 }
  0x90   :  { %v81_v10 = vpack.c.bf16 %v263_v9, %v263_v9 }
  0x92   :  { %238 = vmatmul.msk.bf16.vlgmr.msra.gmra.mxu1 %vm102_vm1, %v81_v10 }
 0x10f   :  { %v115_v21 = vpop.f32.mrf.mxu1 }
 0x110   :  { %v116_v22 = vadd.f32 %v259_v20, %v115_v21 }
 0x112   :  { %264 = vtanh.f32 %v116_v22 }
 0x113   :  { %266 = vpow2.f32 %v158_v27 }
 0x117   :  { %v117_v23 = vpop.f32.mrf.mxu1 }
 0x118   :  { %v265_v24 = vpop.eup %264 }
 0x119   :  { %v120_v25 = vpack.c.bf16 %v265_v24, %v265_v24  ;;  %v267_v28 = vpop.eup %266 }
 0x11a   :  { %v162_v29 = vperm.slane %v267_v28, 0 }
 0x11b   :  { %247 = vmatmul.msk.bf16.vlgmr.msra.gmra.mxu2 %vm102_vm1, %v120_v25 }
 0x11c   :  { %v164_v31 = vmul.f32 %v162_v29, %v160_v13 }
 0x19e   :  { %v153_v32 = vpop.f32.mrf.mxu2 }
 0x19f   :  { %v154_v33 = vadd.f32 %v261_v30, %v153_v32 }
 0x1a1   :  { %v165_v34 = vadd.f32 %v164_v31, %v154_v33 }
 0x1a3   :  { %178 = vrot.lane.b32.xlu0 %v165_v34, %s296_s15 }
 0x1a6   :  { %v155_v35 = vpop.f32.mrf.mxu2 }
 0x215   :  { %v179_v37 = vpop.permute.xlu0 %178 }
 0x216   :  { %v181_v38 = vsel %vm173_vm2, %v154_v33, %v179_v37 }
 0x217   :  { %v183_v39 = vsel %vm182_vm3, %v181_v38, %v176_v36 }
 0x218   :  { %v185_v40 = vsel %vm184_vm4, %v183_v39, 0.0 }
 0x219   :  { %186 = vxpose.xlu1.b32.start.end [1/1] (short) (narrow) %v185_v40, 16 }
 0x2bd   :  { %v202_v41 = vpop.trf.xlu1 }
 0x2be   :  { %218 = vst.msk [vmem:[%s404_s9] sm:$0xff] %vm182_vm3, %v202_v41 }
 0x2c5   :  { %v203_v42 = vpop.trf.xlu1 }
 0x2c6   :  { %219 = vst.msk [vmem:[%s404_s9 + $0x8] sm:$0xff] %vm182_vm3, %v203_v42 }
 0x2c7   :  { %224 = vsyncpa [#allocation3], 1 }

</bundles_post_ra>
